<compile_context>
chip_gen: v7x
topology: tpu7x:2x2x1
jax: 0.10.0
libtpu: 0.0.40
codegen_flags: <defaults>
</compile_context>

<pallas_src>
import functools

import jax
import jax.numpy as jnp
from jax.experimental import pallas as pl
from jax.experimental.pallas import tpu as pltpu

_C1 = 0.01 ** 2
_C2 = 0.03 ** 2


def _ssim_kernel(x_ref, y_ref, o_ref, *, H, W, th):
    """SSIM loss on a (TB, H*W) lane-dense block.

    Each of the TB sublane rows holds one full (H, W) image slice flattened
    row-major into the lane dimension, so all pool/SSIM math and the output
    store are fully lane dense.
    """
    TB, HW = o_ref.shape

    x = x_ref[...]
    y = y_ref[...]
    if x.dtype != jnp.float32:   # skip the cast on the common f32 path
        x = x.astype(jnp.float32)
        y = y.astype(jnp.float32)

    # Lane masks marking the first / last column of each packed W-chunk
    # (these are exactly the ReflectionPad2d(1) columns).  Computed once per
    # grid step; W is a power of two in practice so % is a bitwise AND.
    flat = jax.lax.broadcasted_iota(jnp.int32, (TB, HW), 1)
    if W & (W - 1) == 0:
        col = jnp.bitwise_and(flat, W - 1)
    else:
        col = jax.lax.rem(flat, W)
    is_c0 = col == 0
    is_cl = col == (W - 1)

    def row_neighbors(a):
        # a[i - W] / a[i + W] in the flat layout == the row above / below,
        # with the reflect boundary (row 1 / row H-2) baked directly into the
        # concatenated slices -- no wrap-around value is ever used.
        above = jnp.concatenate([a[:, W:2 * W], a[:, :HW - W]], axis=1)
        below = jnp.concatenate([a[:, W:], a[:, HW - 2 * W:HW - W]], axis=1)
        return above, below

    def col_sum3(a):
        # 3-tap horizontal sum; reflect at each W-chunk boundary via the lane
        # masks (the shifted values that cross a chunk boundary are exactly
        # the ones replaced by the selects, so no cross-image bleed).
        lraw = jnp.concatenate([a[:, :1], a[:, :HW - 1]], axis=1)    # a[i-1]
        rraw = jnp.concatenate([a[:, 1:], a[:, HW - 1:]], axis=1)    # a[i+1]
        left = jnp.where(is_c0, rraw, lraw)                          # col 0   -> col 1
        right = jnp.where(is_cl, lraw, rraw)                         # col W-1 -> col W-2
        return a + left + right

    # Vertical 3-tap sums.  The row shifts of x*x, y*y and x*y are products
    # of the row shifts of x and y, so only four shifted planes are built.
    xa, xb = row_neighbors(x)
    ya, yb = row_neighbors(y)
    vx = x + xa + xb
    vy = y + ya + yb
    vxx = x * x + xa * xa + xb * xb
    vyy = y * y + ya * ya + yb * yb
    vxy = x * y + xa * ya + xb * yb

    # Horizontal 3-tap sums -> raw 3x3 window sums (Sx = 9*mu_x, etc.).
    sx = col_sum3(vx)
    sy = col_sum3(vy)
    sxx = col_sum3(vxx)
    syy = col_sum3(vyy)
    sxy = col_sum3(vxy)

    # SSIM on raw sums: numerator and denominator factors are each scaled by
    # 81, which cancels in the ratio, so the 1/9 normalization is folded into
    # the constants instead of 5 extra vmuls/element.
    c1 = 81.0 * _C1
    c2 = 81.0 * _C2
    sxsy2 = 2.0 * (sx * sy)
    ssim_n = (sxsy2 + c1) * (18.0 * sxy - sxsy2 + c2)
    s2 = sx * sx + sy * sy
    ssim_d = (s2 + c1) * (9.0 * (sxx + syy) - s2 + c2)

    # EUP approximate reciprocal (own VLIW slot) + one Newton step back to
    # ~f32 accuracy (ssim_d >= 81*C1 * 81*C2 > 0, well conditioned).
    r = pl.reciprocal(ssim_d, approx=True)
    r = r * (2.0 - ssim_d * r)
    loss = (1.0 - ssim_n * r) * 0.5
    o_ref[...] = jnp.clip(loss, 0.0, th).astype(o_ref.dtype)


def _pick_block_batch(nc, hw):
    """Number of (N*C) slices per grid step.

    Sized against an explicit VMEM budget that is safe on every TPU
    generation (v7x only has 64 MiB physical VMEM), kept a multiple of 8
    sublanes, and capped so large batches still produce >= ~8 grid steps
    (keeps both v7x TensorCores fed with a double-buffered pipeline).
    """
    per_slice_bytes = 28 * 4 * hw          # ~28 live f32 planes incl. double buffers
    budget = 24 * 1024 * 1024
    cap = max(8, min(1024, (budget // max(per_slice_bytes, 1)) // 8 * 8))
    tb = min(cap, max(8, ((nc + 63) // 64) * 8))
    return tb


def ssim(x, y, th=1.0):
    """SSIM loss map, matching the PyTorch SSIM module's forward().

    x, y: float arrays of shape (N, C, H, W).  Returns (N, C, H, W).
    """
    N, C, H, W = x.shape
    nc = N * C
    hw = H * W

    # Pure reshapes (no data movement): one image slice per row, flattened
    # row-major into the lane dimension (lane dense whenever H*W >= 128).
    xf = x.reshape(nc, hw)
    yf = y.reshape(nc, hw)

    tb = _pick_block_batch(nc, hw)
    nc_pad = pl.cdiv(nc, tb) * tb
    if nc_pad != nc:
        # Pad awkward batch sizes instead of degrading to tiny blocks; padded
        # rows are zeros (SSIM(0,0) is finite, no NaN risk) and sliced off.
        xf = jnp.pad(xf, ((0, nc_pad - nc), (0, 0)))
        yf = jnp.pad(yf, ((0, nc_pad - nc), (0, 0)))

    kernel = functools.partial(_ssim_kernel, H=H, W=W, th=float(th))
    out = pl.pallas_call(
        kernel,
        out_shape=jax.ShapeDtypeStruct((nc_pad, hw), x.dtype),
        grid=(nc_pad // tb,),
        in_specs=[
            pl.BlockSpec((tb, hw), lambda i: (i, 0)),
            pl.BlockSpec((tb, hw), lambda i: (i, 0)),
        ],
        out_specs=pl.BlockSpec((tb, hw), lambda i: (i, 0)),
        compiler_params=pltpu.CompilerParams(
            dimension_semantics=("parallel",),
            vmem_limit_bytes=48 * 1024 * 1024,
        ),
    )(xf, yf)

    if nc_pad != nc:
        out = out[:nc]
    return out.reshape(N, C, H, W)


def _ssim_ref(x, y, th=1.0):
    # Pure-JAX reference for a correctness sanity check.
    pad = ((0, 0), (0, 0), (1, 1), (1, 1))
    xp = jnp.pad(x, pad, mode="reflect")
    yp = jnp.pad(y, pad, mode="reflect")

    def pool3(a):
        N, C, Hp, Wp = a.shape
        H, W = Hp - 2, Wp - 2
        s = jnp.zeros((N, C, H, W), a.dtype)
        for di in range(3):
            for dj in range(3):
                s = s + a[:, :, di:di + H, dj:dj + W]
        return s / 9.0

    mu_x = pool3(xp)
    mu_y = pool3(yp)
    sigma_x = pool3(xp ** 2) - mu_x ** 2
    sigma_y = pool3(yp ** 2) - mu_y ** 2
    sigma_xy = pool3(xp * yp) - mu_x * mu_y
    n = (2 * mu_x * mu_y + _C1) * (2 * sigma_xy + _C2)
    d = (mu_x ** 2 + mu_y ** 2 + _C1) * (sigma_x + sigma_y + _C2)
    return jnp.clip((1 - n / d) / 2, 0.0, th)


if __name__ == "__main__":
    key = jax.random.PRNGKey(0)
    kx, ky, kx2, ky2 = jax.random.split(key, 4)

    # Main test: (2, 4, 16, 16) -> nc = 8 slices, one lane-dense (8, 256) block.
    N, C, H, W = 2, 4, 16, 16
    x = jax.random.uniform(kx, (N, C, H, W), dtype=jnp.float32)
    y = jax.random.uniform(ky, (N, C, H, W), dtype=jnp.float32)

    out = jax.block_until_ready(ssim(x, y, th=1.0))
    ref = _ssim_ref(x, y, th=1.0)
    assert out.shape == (N, C, H, W)
    assert jnp.allclose(out, ref, atol=1e-5, rtol=1e-5), "mismatch vs reference"

    # Second test exercises the nc-padding path (nc = 6 padded up to 8).
    x2 = jax.random.uniform(kx2, (2, 3, 16, 16), dtype=jnp.float32)
    y2 = jax.random.uniform(ky2, (2, 3, 16, 16), dtype=jnp.float32)
    out2 = jax.block_until_ready(ssim(x2, y2, th=1.0))
    ref2 = _ssim_ref(x2, y2, th=1.0)
    assert out2.shape == x2.shape
    assert jnp.allclose(out2, ref2, atol=1e-5, rtol=1e-5), "mismatch vs reference (padded nc)"

    print("KERNEL_OK")
</pallas_src>

<mosaic_0001>
module attributes {stable_mosaic.version = 11 : i64} {
  func.func @_ssim_kernel(%arg0: i32, %arg1: memref<8x256xf32, #tpu.memory_space<vmem>>, %arg2: memref<8x256xf32, #tpu.memory_space<vmem>>, %arg3: memref<8x256xf32, #tpu.memory_space<vmem>>) attributes {dimension_semantics = [#tpu.dimension_semantics<parallel>], iteration_bounds = array<i64: 1>, scalar_prefetch = 0 : i64, scratch_operands = 0 : i64, tpu.core_type = #tpu.core_type<tc>, window_params = [{transform_indices = @transform_0, window_bounds = array<i64: 8, 256>}, {transform_indices = @transform_1, window_bounds = array<i64: 8, 256>}, {transform_indices = @transform_2, window_bounds = array<i64: 8, 256>}]} {
    %c0 = arith.constant 0 : index
    %c0_0 = arith.constant 0 : index
    %0 = vector.load %arg1[%c0, %c0_0] : memref<8x256xf32, #tpu.memory_space<vmem>>, vector<8x256xf32>
    %c0_1 = arith.constant 0 : index
    %c0_2 = arith.constant 0 : index
    %1 = vector.load %arg2[%c0_1, %c0_2] : memref<8x256xf32, #tpu.memory_space<vmem>>, vector<8x256xf32>
    %2 = tpu.iota {dimensions = array<i32: 1>} : vector<8x256xi32>
    %c15_i32 = arith.constant 15 : i32
    %3 = vector.broadcast %c15_i32 : i32 to vector<8x256xi32>
    %4 = arith.andi %2, %3 : vector<8x256xi32>
    %c0_i32 = arith.constant 0 : i32
    %5 = vector.broadcast %c0_i32 : i32 to vector<8x256xi32>
    %6 = arith.cmpi eq, %4, %5 : vector<8x256xi32>
    %c15_i32_3 = arith.constant 15 : i32
    %7 = vector.broadcast %c15_i32_3 : i32 to vector<8x256xi32>
    %8 = arith.cmpi eq, %4, %7 : vector<8x256xi32>
    %9 = vector.extract_strided_slice %0 {offsets = [0, 16], sizes = [8, 16], strides = [1, 1]} : vector<8x256xf32> to vector<8x16xf32>
    %10 = vector.extract_strided_slice %0 {offsets = [0, 0], sizes = [8, 240], strides = [1, 1]} : vector<8x256xf32> to vector<8x240xf32>
    %11 = tpu.concatenate %9, %10 in 1 : vector<8x16xf32>, vector<8x240xf32> -> vector<8x256xf32>
    %12 = vector.extract_strided_slice %0 {offsets = [0, 16], sizes = [8, 240], strides = [1, 1]} : vector<8x256xf32> to vector<8x240xf32>
    %13 = vector.extract_strided_slice %0 {offsets = [0, 224], sizes = [8, 16], strides = [1, 1]} : vector<8x256xf32> to vector<8x16xf32>
    %14 = tpu.concatenate %12, %13 in 1 : vector<8x240xf32>, vector<8x16xf32> -> vector<8x256xf32>
    %15 = vector.extract_strided_slice %1 {offsets = [0, 16], sizes = [8, 16], strides = [1, 1]} : vector<8x256xf32> to vector<8x16xf32>
    %16 = vector.extract_strided_slice %1 {offsets = [0, 0], sizes = [8, 240], strides = [1, 1]} : vector<8x256xf32> to vector<8x240xf32>
    %17 = tpu.concatenate %15, %16 in 1 : vector<8x16xf32>, vector<8x240xf32> -> vector<8x256xf32>
    %18 = vector.extract_strided_slice %1 {offsets = [0, 16], sizes = [8, 240], strides = [1, 1]} : vector<8x256xf32> to vector<8x240xf32>
    %19 = vector.extract_strided_slice %1 {offsets = [0, 224], sizes = [8, 16], strides = [1, 1]} : vector<8x256xf32> to vector<8x16xf32>
    %20 = tpu.concatenate %18, %19 in 1 : vector<8x240xf32>, vector<8x16xf32> -> vector<8x256xf32>
    %21 = arith.addf %0, %11 : vector<8x256xf32>
    %22 = arith.addf %21, %14 : vector<8x256xf32>
    %23 = arith.addf %1, %17 : vector<8x256xf32>
    %24 = arith.addf %23, %20 : vector<8x256xf32>
    %25 = arith.mulf %0, %0 : vector<8x256xf32>
    %26 = arith.mulf %11, %11 : vector<8x256xf32>
    %27 = arith.addf %25, %26 : vector<8x256xf32>
    %28 = arith.mulf %14, %14 : vector<8x256xf32>
    %29 = arith.addf %27, %28 : vector<8x256xf32>
    %30 = arith.mulf %1, %1 : vector<8x256xf32>
    %31 = arith.mulf %17, %17 : vector<8x256xf32>
    %32 = arith.addf %30, %31 : vector<8x256xf32>
    %33 = arith.mulf %20, %20 : vector<8x256xf32>
    %34 = arith.addf %32, %33 : vector<8x256xf32>
    %35 = arith.mulf %0, %1 : vector<8x256xf32>
    %36 = arith.mulf %11, %17 : vector<8x256xf32>
    %37 = arith.addf %35, %36 : vector<8x256xf32>
    %38 = arith.mulf %14, %20 : vector<8x256xf32>
    %39 = arith.addf %37, %38 : vector<8x256xf32>
    %40 = vector.extract_strided_slice %22 {offsets = [0, 0], sizes = [8, 1], strides = [1, 1]} : vector<8x256xf32> to vector<8x1xf32>
    %41 = vector.extract_strided_slice %22 {offsets = [0, 0], sizes = [8, 255], strides = [1, 1]} : vector<8x256xf32> to vector<8x255xf32>
    %42 = tpu.concatenate %40, %41 in 1 : vector<8x1xf32>, vector<8x255xf32> -> vector<8x256xf32>
    %43 = vector.extract_strided_slice %22 {offsets = [0, 1], sizes = [8, 255], strides = [1, 1]} : vector<8x256xf32> to vector<8x255xf32>
    %44 = vector.extract_strided_slice %22 {offsets = [0, 255], sizes = [8, 1], strides = [1, 1]} : vector<8x256xf32> to vector<8x1xf32>
    %45 = tpu.concatenate %43, %44 in 1 : vector<8x255xf32>, vector<8x1xf32> -> vector<8x256xf32>
    %46 = arith.select %6, %45, %42 : vector<8x256xi1>, vector<8x256xf32>
    %47 = arith.select %8, %42, %45 : vector<8x256xi1>, vector<8x256xf32>
    %48 = arith.addf %22, %46 : vector<8x256xf32>
    %49 = arith.addf %48, %47 : vector<8x256xf32>
    %50 = vector.extract_strided_slice %24 {offsets = [0, 0], sizes = [8, 1], strides = [1, 1]} : vector<8x256xf32> to vector<8x1xf32>
    %51 = vector.extract_strided_slice %24 {offsets = [0, 0], sizes = [8, 255], strides = [1, 1]} : vector<8x256xf32> to vector<8x255xf32>
    %52 = tpu.concatenate %50, %51 in 1 : vector<8x1xf32>, vector<8x255xf32> -> vector<8x256xf32>
    %53 = vector.extract_strided_slice %24 {offsets = [0, 1], sizes = [8, 255], strides = [1, 1]} : vector<8x256xf32> to vector<8x255xf32>
    %54 = vector.extract_strided_slice %24 {offsets = [0, 255], sizes = [8, 1], strides = [1, 1]} : vector<8x256xf32> to vector<8x1xf32>
    %55 = tpu.concatenate %53, %54 in 1 : vector<8x255xf32>, vector<8x1xf32> -> vector<8x256xf32>
    %56 = arith.select %6, %55, %52 : vector<8x256xi1>, vector<8x256xf32>
    %57 = arith.select %8, %52, %55 : vector<8x256xi1>, vector<8x256xf32>
    %58 = arith.addf %24, %56 : vector<8x256xf32>
    %59 = arith.addf %58, %57 : vector<8x256xf32>
    %60 = vector.extract_strided_slice %29 {offsets = [0, 0], sizes = [8, 1], strides = [1, 1]} : vector<8x256xf32> to vector<8x1xf32>
    %61 = vector.extract_strided_slice %29 {offsets = [0, 0], sizes = [8, 255], strides = [1, 1]} : vector<8x256xf32> to vector<8x255xf32>
    %62 = tpu.concatenate %60, %61 in 1 : vector<8x1xf32>, vector<8x255xf32> -> vector<8x256xf32>
    %63 = vector.extract_strided_slice %29 {offsets = [0, 1], sizes = [8, 255], strides = [1, 1]} : vector<8x256xf32> to vector<8x255xf32>
    %64 = vector.extract_strided_slice %29 {offsets = [0, 255], sizes = [8, 1], strides = [1, 1]} : vector<8x256xf32> to vector<8x1xf32>
    %65 = tpu.concatenate %63, %64 in 1 : vector<8x255xf32>, vector<8x1xf32> -> vector<8x256xf32>
    %66 = arith.select %6, %65, %62 : vector<8x256xi1>, vector<8x256xf32>
    %67 = arith.select %8, %62, %65 : vector<8x256xi1>, vector<8x256xf32>
    %68 = arith.addf %29, %66 : vector<8x256xf32>
    %69 = arith.addf %68, %67 : vector<8x256xf32>
    %70 = vector.extract_strided_slice %34 {offsets = [0, 0], sizes = [8, 1], strides = [1, 1]} : vector<8x256xf32> to vector<8x1xf32>
    %71 = vector.extract_strided_slice %34 {offsets = [0, 0], sizes = [8, 255], strides = [1, 1]} : vector<8x256xf32> to vector<8x255xf32>
    %72 = tpu.concatenate %70, %71 in 1 : vector<8x1xf32>, vector<8x255xf32> -> vector<8x256xf32>
    %73 = vector.extract_strided_slice %34 {offsets = [0, 1], sizes = [8, 255], strides = [1, 1]} : vector<8x256xf32> to vector<8x255xf32>
    %74 = vector.extract_strided_slice %34 {offsets = [0, 255], sizes = [8, 1], strides = [1, 1]} : vector<8x256xf32> to vector<8x1xf32>
    %75 = tpu.concatenate %73, %74 in 1 : vector<8x255xf32>, vector<8x1xf32> -> vector<8x256xf32>
    %76 = arith.select %6, %75, %72 : vector<8x256xi1>, vector<8x256xf32>
    %77 = arith.select %8, %72, %75 : vector<8x256xi1>, vector<8x256xf32>
    %78 = arith.addf %34, %76 : vector<8x256xf32>
    %79 = arith.addf %78, %77 : vector<8x256xf32>
    %80 = vector.extract_strided_slice %39 {offsets = [0, 0], sizes = [8, 1], strides = [1, 1]} : vector<8x256xf32> to vector<8x1xf32>
    %81 = vector.extract_strided_slice %39 {offsets = [0, 0], sizes = [8, 255], strides = [1, 1]} : vector<8x256xf32> to vector<8x255xf32>
    %82 = tpu.concatenate %80, %81 in 1 : vector<8x1xf32>, vector<8x255xf32> -> vector<8x256xf32>
    %83 = vector.extract_strided_slice %39 {offsets = [0, 1], sizes = [8, 255], strides = [1, 1]} : vector<8x256xf32> to vector<8x255xf32>
    %84 = vector.extract_strided_slice %39 {offsets = [0, 255], sizes = [8, 1], strides = [1, 1]} : vector<8x256xf32> to vector<8x1xf32>
    %85 = tpu.concatenate %83, %84 in 1 : vector<8x255xf32>, vector<8x1xf32> -> vector<8x256xf32>
    %86 = arith.select %6, %85, %82 : vector<8x256xi1>, vector<8x256xf32>
    %87 = arith.select %8, %82, %85 : vector<8x256xi1>, vector<8x256xf32>
    %88 = arith.addf %39, %86 : vector<8x256xf32>
    %89 = arith.addf %88, %87 : vector<8x256xf32>
    %90 = arith.mulf %49, %59 : vector<8x256xf32>
    %cst = arith.constant 2.000000e+00 : f32
    %91 = vector.broadcast %cst : f32 to vector<8x256xf32>
    %92 = arith.mulf %91, %90 : vector<8x256xf32>
    %cst_4 = arith.constant 8.100000e-03 : f32
    %93 = vector.broadcast %cst_4 : f32 to vector<8x256xf32>
    %94 = arith.addf %92, %93 : vector<8x256xf32>
    %cst_5 = arith.constant 1.800000e+01 : f32
    %95 = vector.broadcast %cst_5 : f32 to vector<8x256xf32>
    %96 = arith.mulf %95, %89 : vector<8x256xf32>
    %97 = arith.subf %96, %92 : vector<8x256xf32>
    %cst_6 = arith.constant 7.290000e-02 : f32
    %98 = vector.broadcast %cst_6 : f32 to vector<8x256xf32>
    %99 = arith.addf %97, %98 : vector<8x256xf32>
    %100 = arith.mulf %94, %99 : vector<8x256xf32>
    %101 = arith.mulf %49, %49 : vector<8x256xf32>
    %102 = arith.mulf %59, %59 : vector<8x256xf32>
    %103 = arith.addf %101, %102 : vector<8x256xf32>
    %cst_7 = arith.constant 8.100000e-03 : f32
    %104 = vector.broadcast %cst_7 : f32 to vector<8x256xf32>
    %105 = arith.addf %103, %104 : vector<8x256xf32>
    %106 = arith.addf %69, %79 : vector<8x256xf32>
    %cst_8 = arith.constant 9.000000e+00 : f32
    %107 = vector.broadcast %cst_8 : f32 to vector<8x256xf32>
    %108 = arith.mulf %107, %106 : vector<8x256xf32>
    %109 = arith.subf %108, %103 : vector<8x256xf32>
    %cst_9 = arith.constant 7.290000e-02 : f32
    %110 = vector.broadcast %cst_9 : f32 to vector<8x256xf32>
    %111 = arith.addf %109, %110 : vector<8x256xf32>
    %112 = arith.mulf %105, %111 : vector<8x256xf32>
    %113 = tpu.reciprocal %112 {approx = true} : vector<8x256xf32> -> vector<8x256xf32>
    %114 = arith.mulf %112, %113 : vector<8x256xf32>
    %cst_10 = arith.constant 2.000000e+00 : f32
    %115 = vector.broadcast %cst_10 : f32 to vector<8x256xf32>
    %116 = arith.subf %115, %114 : vector<8x256xf32>
    %117 = arith.mulf %113, %116 : vector<8x256xf32>
    %118 = arith.mulf %100, %117 : vector<8x256xf32>
    %cst_11 = arith.constant 1.000000e+00 : f32
    %119 = vector.broadcast %cst_11 : f32 to vector<8x256xf32>
    %120 = arith.subf %119, %118 : vector<8x256xf32>
    %cst_12 = arith.constant 5.000000e-01 : f32
    %121 = vector.broadcast %cst_12 : f32 to vector<8x256xf32>
    %122 = arith.mulf %120, %121 : vector<8x256xf32>
    %cst_13 = arith.constant 0.000000e+00 : f32
    %cst_14 = arith.constant 1.000000e+00 : f32
    %123 = vector.broadcast %cst_13 : f32 to vector<8x256xf32>
    %124 = arith.maximumf %123, %122 : vector<8x256xf32>
    %125 = vector.broadcast %cst_14 : f32 to vector<8x256xf32>
    %126 = arith.minimumf %125, %124 : vector<8x256xf32>
    %c0_15 = arith.constant 0 : index
    %c0_16 = arith.constant 0 : index
    %127 = vector.load %arg3[%c0_15, %c0_16] : memref<8x256xf32, #tpu.memory_space<vmem>>, vector<8x256xf32>
    tpu.vector_store %arg3[%c0_15, %c0_16], %126 {strides = array<i32>} : memref<8x256xf32, #tpu.memory_space<vmem>>, vector<8x256xf32>,
    return
  }
  func.func @transform_0(%arg0: i32) -> (i32, i32) {
    %c0_i32 = arith.constant 0 : i32
    %c0_i32_0 = arith.constant 0 : i32
    return %arg0, %c0_i32 : i32, i32
  }
  func.func @transform_1(%arg0: i32) -> (i32, i32) {
    %c0_i32 = arith.constant 0 : i32
    %c0_i32_0 = arith.constant 0 : i32
    return %arg0, %c0_i32 : i32, i32
  }
  func.func @transform_2(%arg0: i32) -> (i32, i32) {
    %c0_i32 = arith.constant 0 : i32
    %c0_i32_0 = arith.constant 0 : i32
    return %arg0, %c0_i32 : i32, i32
  }
}

</mosaic_0001>

<bundles_post_ra>
// kernel: tpu_custom_call.1
= control target key start
LH: loop header
LB: loop body
LE: loop exit
PB: predicated region body
PF: predicated region fallthrough
CT: control target
= control target key end

     0   :  { %7 = vsyncpa [#allocation3], 0  ;;  %s662_s0 = inlined_call_operand.hbm [shape: f32[8,256], index: 0, kind: input, shape index: {}]   ;;  %s663_s1 = inlined_call_operand.hbm [shape: f32[8,256], index: 1, kind: input, shape index: {}]   ;;  %s664_s2 = inlined_call_operand.hbm [shape: f32[8,256], index: 2, kind: output, shape index: {}]  }
   0x1   :  { %8 = vsyncpa [#allocation6], 0 }
   0x2   :  { %9 = vsyncpa [#allocation4], 0  ;;  %s412_s9 = smov [#allocation2]   ;;  %s413_s11 = smov [#allocation5]  }
   0x3   :  { %s16_s10 = sshll.u32 %s412_s9, 4  ;;  %s26_s12 = sshll.u32 %s413_s11, 4  ;;  %s17_s10 = int_to_ptr.vmem [resolvable:$true] %s16_s10  ;;  %s27_s12 = int_to_ptr.vmem [resolvable:$true] %s26_s12 }
   0x4   :  { %s340_s15 = scalar_lea.hbm %s662_s0, 256 }
   0x5   :  { %p341_p0 = scmp.ne.s32.totalorder %s662_s0, %s340_s15  ;;  %p344_p1 = scmp.lt.u32.totalorder %s340_s15, %s662_s0 }
   0x7   :  { %p346_p2 = pnand %p344_p1, %p341_p0 }
   0x9   :  { %349 = shalt.err (!%p346_p2)
}
   0xa   :  { %s350_s20 = scalar_lea.vmem %s17_s10, 256  ;;  %p355_p4 = scmp.lt.s32.totalorder %s17_s10, %s17_s10 }
   0xb   :  { %p351_p3 = scmp.ne.s32.totalorder %s17_s10, %s350_s20  ;;  %p356_p5 = scmp.lt.s32.totalorder %s350_s20, %s350_s20 }
   0xd   :  { %p357_p6 = por %p356_p5, %p355_p4 }
   0xf   :  { %p358_p7 = pnand %p357_p6, %p351_p3 }
  0x11   :  { %361 = shalt.err (!%p358_p7)
}
  0x12   :  { %19 = dma.hbm_to_vmem [thread:$0]  %s662_s0, 256, %s17_s10, [#allocation3]  }
  0x13   :  { %s362_s25 = scalar_lea.hbm %s663_s1, 256 }
  0x14   :  { %p363_p8 = scmp.ne.s32.totalorder %s663_s1, %s362_s25  ;;  %p366_p9 = scmp.lt.u32.totalorder %s362_s25, %s663_s1 }
  0x16   :  { %p368_p10 = pnand %p366_p9, %p363_p8 }
  0x18   :  { %371 = shalt.err (!%p368_p10)
}
  0x19   :  { %s372_s30 = scalar_lea.vmem %s27_s12, 256  ;;  %p377_p12 = scmp.lt.s32.totalorder %s27_s12, %s27_s12 }
  0x1a   :  { %p373_p11 = scmp.ne.s32.totalorder %s27_s12, %s372_s30  ;;  %p378_p13 = scmp.lt.s32.totalorder %s372_s30, %s372_s30 }
  0x1c   :  { %p379_p0 = por %p378_p13, %p377_p12 }
  0x1e   :  { %p380_p1 = pnand %p379_p0, %p373_p11 }
  0x20   :  { %383 = shalt.err (!%p380_p1)
}
  0x21   :  { %29 = dma.hbm_to_vmem [thread:$0]  %s663_s1, 256, %s27_s12, [#allocation6]  }
  0x22   :  { %406 = dma.done.wait [#allocation3], 256  }
  0x23   :  { %407 = vsyncadd [#allocation3], 4294967040 }
  0x24   :  { %408 = dma.done.wait [#allocation6], 256  }
  0x25   :  { %409 = vsyncadd [#allocation6], 4294967040  ;;  %v458_v0 = vld [vmem:[#allocation2 + $0x8] sm:$0xff]  ;;  %v460_v1 = vld [vmem:[#allocation2] sm:$0xff]  ;;  %s414_s4 = smov 16   ;;  %s415_s5 = smov 112   ;;  %v40_v60 = vlaneseq }
  0x26   :  { %56 = vrot.lane.b32.xlu1 %v458_v0, %s414_s4  ;;  %50 = vrot.lane.b32.xlu0 %v460_v1, %s415_s5  ;;  %v464_v2 = vld [vmem:[#allocation5] sm:$0xff]  ;;  %v468_v3 = vld [vmem:[#allocation5 + $0x8] sm:$0xff]  ;;  %vm58_vm0 = vcmask 130048   ;;  %vm65_vm1 = vcmask 916480   ;;  %s416_s1 = smov 1   ;;  %s417_s6 = smov 127   ;;  %v100_v28 = vmul.f32 %v458_v0, %v458_v0  ;;  %v99_v29 = vmul.f32 %v460_v1, %v460_v1 }
  0x27   :  { %v109_v38 = vmul.f32 %v464_v2, %v464_v2  ;;  %v110_v39 = vmul.f32 %v468_v3, %v468_v3  ;;  %v120_v48 = vmul.f32 %v468_v3, %v458_v0  ;;  %v119_v49 = vmul.f32 %v464_v2, %v460_v1  ;;  %s418_s7 = smov [#allocation7]  }
  0x28   :  { %v41_v63 = vand.u32 127, %v40_v60  ;;  %vm144_vm2 = vcmask 1039360   ;;  %vm135_vm3 = vcmask 7168   ;;  %s319_s8 = sshll.u32 %s418_s7, 4  ;;  %s320_s8 = int_to_ptr.vmem [resolvable:$true] %s319_s8 }
  0x29   :  { %s384_s9 = scalar_lea.vmem %s320_s8, 256  ;;  %p389_p3 = scmp.lt.s32.totalorder %s320_s8, %s320_s8 }
  0x2a   :  { %72 = vrot.lane.b32.xlu1 %v464_v2, %s415_s5  ;;  %54 = vrot.lane.b32.xlu0 %v460_v1, %s414_s4  ;;  %p385_p2 = scmp.ne.s32.totalorder %s320_s8, %s384_s9  ;;  %p390_p4 = scmp.lt.s32.totalorder %s384_s9, %s384_s9 }
  0x2c   :  { %p391_p5 = por %p390_p4, %p389_p3 }
  0x2e   :  { %78 = vrot.lane.b32.xlu1 %v468_v3, %s414_s4  ;;  %76 = vrot.lane.b32.xlu0 %v464_v2, %s414_s4  ;;  %p392_p6 = pnand %p391_p5, %p385_p2 }
  0x32   :  { %84 = vrot.lane.b32.xlu1 %v468_v3, %s415_s5  ;;  %63 = vrot.lane.b32.xlu0 %v458_v0, %s415_s5 }
  0x98   :  { %v57_v4 = vpop.permute.xlu1 %56  ;;  %v51_v5 = vpop.permute.xlu0 %50 }
  0x9c   :  { %v55_v6 = vpop.permute.xlu0 %54  ;;  %v73_v7 = vpop.permute.xlu1 %72 }
  0x9d   :  { %v59_v9 = vsel %vm58_vm0, %v55_v6, %v57_v4  ;;  %v62_v10 = vsel %vm58_vm0, %v51_v5, %v55_v6  ;;  %v43_v6 = vand.u32 15, %v41_v63 }
  0x9e   :  { %v91_v13 = vadd.f32 %v62_v10, %v460_v1  ;;  %v92_v14 = vadd.f32 %v59_v9, %v458_v0  ;;  %v101_v30 = vmul.f32 %v62_v10, %v62_v10  ;;  %v102_v31 = vmul.f32 %v59_v9, %v59_v9 }
  0x9f   :  { %vm561_vm5 = vcmp.eq.s32.totalorder %v43_v6, 0  ;;  %vm594_vm7 = vcmp.eq.s32.totalorder %v43_v6, 15 }
  0xa0   :  { %v77_v8 = vpop.permute.xlu0 %76  ;;  %v79_v11 = vpop.permute.xlu1 %78  ;;  %v103_v34 = vadd.f32 %v101_v30, %v99_v29  ;;  %v104_v35 = vadd.f32 %v102_v31, %v100_v28 }
  0xa1   :  { %v80_v20 = vsel %vm58_vm0, %v77_v8, %v79_v11  ;;  %v83_v21 = vsel %vm58_vm0, %v73_v7, %v77_v8 }
  0xa2   :  { %v95_v24 = vadd.f32 %v83_v21, %v464_v2  ;;  %v96_v25 = vadd.f32 %v80_v20, %v468_v3  ;;  %v111_v40 = vmul.f32 %v83_v21, %v83_v21  ;;  %v112_v41 = vmul.f32 %v80_v20, %v80_v20 }
  0xa3   :  { %v121_v50 = vmul.f32 %v83_v21, %v62_v10  ;;  %v122_v51 = vmul.f32 %v80_v20, %v59_v9  ;;  %v42_v2 = vadd.s32 128, %v41_v63 }
  0xa4   :  { %v64_v12 = vpop.permute.xlu0 %63  ;;  %v85_v19 = vpop.permute.xlu1 %84  ;;  %v113_v44 = vadd.f32 %v111_v40, %v109_v38  ;;  %v114_v45 = vadd.f32 %v112_v41, %v110_v39 }
  0xa5   :  { %v66_v15 = vsel %vm65_vm1, %v51_v5, %v64_v12  ;;  %v70_v16 = vsel %vm65_vm1, %v64_v12, %v57_v4  ;;  %v86_v22 = vsel %vm65_vm1, %v73_v7, %v85_v19  ;;  %v90_v23 = vsel %vm65_vm1, %v85_v19, %v79_v11 }
  0xa6   :  { %v478_v17 = vadd.f32 %v91_v13, %v66_v15  ;;  %v480_v18 = vadd.f32 %v92_v14, %v70_v16  ;;  %v494_v26 = vadd.f32 %v95_v24, %v86_v22  ;;  %v496_v27 = vadd.f32 %v96_v25, %v90_v23 }
  0xa7   :  { %v105_v32 = vmul.f32 %v66_v15, %v66_v15  ;;  %v106_v33 = vmul.f32 %v70_v16, %v70_v16  ;;  %v115_v42 = vmul.f32 %v86_v22, %v86_v22  ;;  %v116_v43 = vmul.f32 %v90_v23, %v90_v23 }
  0xa8   :  { %133 = vrot.lane.b32.xlu1 %v480_v18, %s416_s1  ;;  %131 = vrot.lane.b32.xlu0 %v478_v17, %s416_s1  ;;  %v125_v52 = vmul.f32 %v86_v22, %v66_v15  ;;  %v126_v53 = vmul.f32 %v90_v23, %v70_v16  ;;  %v123_v54 = vadd.f32 %v121_v50, %v119_v49  ;;  %v44_v5 = vand.u32 15, %v42_v2 }
  0xa9   :  { %v510_v36 = vadd.f32 %v105_v32, %v103_v34  ;;  %v512_v37 = vadd.f32 %v106_v33, %v104_v35  ;;  %v526_v46 = vadd.f32 %v115_v42, %v113_v44  ;;  %v528_v47 = vadd.f32 %v116_v43, %v114_v45 }
  0xaa   :  { %v124_v55 = vadd.f32 %v122_v51, %v120_v48  ;;  %v542_v56 = vadd.f32 %v125_v52, %v123_v54  ;;  %vm557_vm4 = vcmp.eq.s32.totalorder %v44_v5, 0  ;;  %vm590_vm6 = vcmp.eq.s32.totalorder %v44_v5, 15 }
  0xac   :  { %142 = vrot.lane.b32.xlu1 %v480_v18, %s417_s6  ;;  %140 = vrot.lane.b32.xlu0 %v478_v17, %s417_s6  ;;  %v544_v57 = vadd.f32 %v126_v53, %v124_v55 }
  0xb0   :  { %161 = vrot.lane.b32.xlu1 %v496_v27, %s416_s1  ;;  %159 = vrot.lane.b32.xlu0 %v494_v26, %s416_s1 }
  0xb4   :  { %169 = vrot.lane.b32.xlu1 %v496_v27, %s417_s6  ;;  %167 = vrot.lane.b32.xlu0 %v494_v26, %s417_s6 }
  0xb8   :  { %187 = vrot.lane.b32.xlu1 %v512_v37, %s416_s1  ;;  %185 = vrot.lane.b32.xlu0 %v510_v36, %s416_s1 }
  0xbc   :  { %195 = vrot.lane.b32.xlu1 %v512_v37, %s417_s6  ;;  %193 = vrot.lane.b32.xlu0 %v510_v36, %s417_s6 }
  0xc0   :  { %213 = vrot.lane.b32.xlu1 %v528_v47, %s416_s1  ;;  %211 = vrot.lane.b32.xlu0 %v526_v46, %s416_s1 }
  0xc4   :  { %221 = vrot.lane.b32.xlu1 %v528_v47, %s417_s6  ;;  %219 = vrot.lane.b32.xlu0 %v526_v46, %s417_s6 }
  0xc8   :  { %239 = vrot.lane.b32.xlu1 %v544_v57, %s416_s1  ;;  %237 = vrot.lane.b32.xlu0 %v542_v56, %s416_s1 }
  0xcc   :  { %247 = vrot.lane.b32.xlu1 %v544_v57, %s417_s6  ;;  %245 = vrot.lane.b32.xlu0 %v542_v56, %s417_s6 }
 0x11a   :  { %v134_v58 = vpop.permute.xlu1 %133  ;;  %v132_v59 = vpop.permute.xlu0 %131 }
 0x11b   :  { %v136_v23 = vsel %vm135_vm3, %v132_v59, %v134_v58  ;;  %v139_v24 = vsel %vm135_vm3, %v478_v17, %v132_v59 }
 0x11e   :  { %v143_v61 = vpop.permute.xlu1 %142  ;;  %v141_v62 = vpop.permute.xlu0 %140 }
 0x11f   :  { %v148_v15 = vsel %vm144_vm2, %v143_v61, %v480_v18  ;;  %v145_v16 = vsel %vm144_vm2, %v141_v62, %v143_v61 }
 0x120   :  { %v150_v29 = vsel %vm557_vm4, %v148_v15, %v136_v23  ;;  %v149_v30 = vsel %vm561_vm5, %v145_v16, %v139_v24  ;;  %v152_v49 = vsel %vm590_vm6, %v136_v23, %v148_v15  ;;  %v151_v50 = vsel %vm594_vm7, %v139_v24, %v145_v16 }
 0x121   :  { %v154_v41 = vadd.f32 %v150_v29, %v480_v18  ;;  %v153_v42 = vadd.f32 %v149_v30, %v478_v17 }
 0x122   :  { %v162_v0 = vpop.permute.xlu1 %161  ;;  %v160_v1 = vpop.permute.xlu0 %159 }
 0x123   :  { %v163_v13 = vsel %vm135_vm3, %v160_v1, %v162_v0  ;;  %v166_v14 = vsel %vm135_vm3, %v494_v26, %v160_v1  ;;  %v156_v59 = vadd.f32 %v154_v41, %v152_v49  ;;  %v155_v60 = vadd.f32 %v153_v42, %v151_v50 }
 0x126   :  { %v170_v3 = vpop.permute.xlu1 %169  ;;  %v168_v4 = vpop.permute.xlu0 %167 }
 0x127   :  { %v174_v9 = vsel %vm144_vm2, %v170_v3, %v496_v27  ;;  %v171_v10 = vsel %vm144_vm2, %v168_v4, %v170_v3 }
 0x128   :  { %v176_v19 = vsel %vm557_vm4, %v174_v9, %v163_v13  ;;  %v175_v20 = vsel %vm561_vm5, %v171_v10, %v166_v14  ;;  %v178_v43 = vsel %vm590_vm6, %v163_v13, %v174_v9  ;;  %v177_v44 = vsel %vm594_vm7, %v166_v14, %v171_v10 }
 0x129   :  { %v180_v31 = vadd.f32 %v176_v19, %v496_v27  ;;  %v179_v32 = vadd.f32 %v175_v20, %v494_v26  ;;  %v276_v10 = vmul.f32 %v156_v59, %v156_v59 }
 0x12a   :  { %v188_v7 = vpop.permute.xlu1 %187  ;;  %v186_v8 = vpop.permute.xlu0 %185 }
 0x12b   :  { %v189_v33 = vsel %vm135_vm3, %v186_v8, %v188_v7  ;;  %v192_v34 = vsel %vm135_vm3, %v510_v36, %v186_v8  ;;  %v182_v45 = vadd.f32 %v180_v31, %v178_v43  ;;  %v181_v48 = vadd.f32 %v179_v32, %v177_v44 }
 0x12d   :  { %v277_v62 = vmul.f32 %v181_v48, %v181_v48  ;;  %v262_v49 = vmul.f32 %v182_v45, %v156_v59  ;;  %v261_v50 = vmul.f32 %v181_v48, %v155_v60 }
 0x12e   :  { %v196_v21 = vpop.permute.xlu1 %195  ;;  %v194_v22 = vpop.permute.xlu0 %193 }
 0x12f   :  { %v200_v25 = vsel %vm144_vm2, %v196_v21, %v512_v37  ;;  %v197_v28 = vsel %vm144_vm2, %v194_v22, %v196_v21 }
 0x130   :  { %v202_v27 = vsel %vm557_vm4, %v200_v25, %v189_v33  ;;  %v201_v26 = vsel %vm561_vm5, %v197_v28, %v192_v34  ;;  %v204_v1 = vsel %vm590_vm6, %v189_v33, %v200_v25  ;;  %v203_v2 = vsel %vm594_vm7, %v192_v34, %v197_v28 }
 0x131   :  { %v206_v51 = vadd.f32 %v202_v27, %v512_v37  ;;  %v205_v18 = vadd.f32 %v201_v26, %v510_v36  ;;  %v278_v37 = vmul.f32 %v182_v45, %v182_v45 }
 0x132   :  { %v214_v35 = vpop.permute.xlu1 %213  ;;  %v212_v38 = vpop.permute.xlu0 %211 }
 0x133   :  { %v215_v53 = vsel %vm135_vm3, %v212_v38, %v214_v35  ;;  %v218_v54 = vsel %vm135_vm3, %v526_v46, %v212_v38  ;;  %v208_v7 = vadd.f32 %v206_v51, %v204_v1  ;;  %v207_v8 = vadd.f32 %v205_v18, %v203_v2 }
 0x134   :  { %v280_v15 = vadd.f32 %v278_v37, %v276_v10  ;;  %v264_v18 = vmul.f32 2.0, %v262_v49 }
 0x136   :  { %v222_v52 = vpop.permute.xlu1 %221  ;;  %v220_v17 = vpop.permute.xlu0 %219  ;;  %v282_v33 = vadd.f32 0.0081, %v280_v15 }
 0x137   :  { %v226_v55 = vsel %vm144_vm2, %v222_v52, %v528_v47  ;;  %v223_v58 = vsel %vm144_vm2, %v220_v17, %v222_v52  ;;  %v263_v52 = vmul.f32 2.0, %v261_v50 }
 0x138   :  { %v228_v61 = vsel %vm557_vm4, %v226_v55, %v215_v53  ;;  %v227_v36 = vsel %vm561_vm5, %v223_v58, %v218_v54  ;;  %v230_v3 = vsel %vm590_vm6, %v215_v53, %v226_v55  ;;  %v229_v4 = vsel %vm594_vm7, %v218_v54, %v223_v58 }
 0x139   :  { %v232_v63 = vadd.f32 %v228_v61, %v528_v47  ;;  %v231_v0 = vadd.f32 %v227_v36, %v526_v46  ;;  %v275_v46 = vmul.f32 %v155_v60, %v155_v60  ;;  %v266_v36 = vadd.f32 0.0081, %v264_v18 }
 0x13a   :  { %v240_v5 = vpop.permute.xlu1 %239  ;;  %v238_v6 = vpop.permute.xlu0 %237  ;;  %v265_v37 = vadd.f32 0.0081, %v263_v52 }
 0x13b   :  { %v234_v9 = vadd.f32 %v232_v63, %v230_v3  ;;  %v233_v47 = vadd.f32 %v231_v0, %v229_v4  ;;  %v279_v16 = vadd.f32 %v277_v62, %v275_v46  ;;  %v241_v19 = vsel %vm135_vm3, %v238_v6, %v240_v5 }
 0x13c   :  { %v244_v20 = vsel %vm135_vm3, %v542_v56, %v238_v6 }
 0x13d   :  { %v284_v13 = vadd.f32 %v234_v9, %v208_v7  ;;  %v283_v14 = vadd.f32 %v233_v47, %v207_v8  ;;  %v281_v35 = vadd.f32 0.0081, %v279_v16 }
 0x13e   :  { %v248_v21 = vpop.permute.xlu1 %247  ;;  %v246_v22 = vpop.permute.xlu0 %245 }
 0x13f   :  { %v286_v23 = vmul.f32 9.0, %v284_v13  ;;  %v285_v24 = vmul.f32 9.0, %v283_v14  ;;  %v252_v25 = vsel %vm144_vm2, %v248_v21, %v544_v57  ;;  %v249_v28 = vsel %vm144_vm2, %v246_v22, %v248_v21 }
 0x140   :  { %v254_v29 = vsel %vm557_vm4, %v252_v25, %v241_v19  ;;  %v253_v30 = vsel %vm561_vm5, %v249_v28, %v244_v20  ;;  %v256_v43 = vsel %vm590_vm6, %v241_v19, %v252_v25  ;;  %v255_v12 = vsel %vm594_vm7, %v244_v20, %v249_v28 }
 0x141   :  { %v288_v31 = vsub.f32 %v286_v23, %v280_v15  ;;  %v287_v32 = vsub.f32 %v285_v24, %v279_v16  ;;  %v258_v34 = vadd.f32 %v254_v29, %v544_v57  ;;  %v257_v26 = vadd.f32 %v253_v30, %v542_v56 }
 0x143   :  { %v290_v38 = vadd.f32 0.0729, %v288_v31  ;;  %v289_v27 = vadd.f32 0.0729, %v287_v32  ;;  %v260_v11 = vadd.f32 %v258_v34, %v256_v43  ;;  %v259_v44 = vadd.f32 %v257_v26, %v255_v12 }
 0x145   :  { %v292_v41 = vmul.f32 %v290_v38, %v282_v33  ;;  %v291_v42 = vmul.f32 %v289_v27, %v281_v35  ;;  %v268_v57 = vmul.f32 18.0, %v260_v11  ;;  %v267_v51 = vmul.f32 18.0, %v259_v44 }
 0x147   :  { %336 = vrcp.f32 %v292_v41  ;;  %v270_v17 = vsub.f32 %v268_v57, %v264_v18  ;;  %v269_v56 = vsub.f32 %v267_v51, %v263_v52 }
 0x148   :  { %338 = vrcp.f32 %v291_v42 }
 0x149   :  { %v272_v55 = vadd.f32 0.0729, %v270_v17  ;;  %v271_v58 = vadd.f32 0.0729, %v269_v56 }
 0x14b   :  { %v274_v63 = vmul.f32 %v272_v55, %v266_v36  ;;  %v273_v59 = vmul.f32 %v271_v58, %v265_v37 }
 0x151   :  { %v337_v53 = vpop.eup %336 }
 0x152   :  { %v339_v54 = vpop.eup %338  ;;  %v296_v39 = vmul.f32 %v337_v53, %v292_v41 }
 0x153   :  { %v295_v61 = vmul.f32 %v339_v54, %v291_v42 }
 0x154   :  { %v298_v40 = vsub.f32 2.0, %v296_v39 }
 0x155   :  { %v297_v62 = vsub.f32 2.0, %v295_v61 }
 0x156   :  { %v300_v45 = vmul.f32 %v337_v53, %v298_v40 }
 0x157   :  { %v299_v48 = vmul.f32 %v339_v54, %v297_v62 }
 0x158   :  { %v302_v60 = vmul.f32 %v300_v45, %v274_v63 }
 0x159   :  { %v301_v0 = vmul.f32 %v299_v48, %v273_v59 }
 0x15a   :  { %v304_v1 = vsub.f32 1.0, %v302_v60 }
 0x15b   :  { %v303_v2 = vsub.f32 1.0, %v301_v0 }
 0x15c   :  { %v306_v3 = vmul.f32 0.5, %v304_v1 }
 0x15d   :  { %v305_v4 = vmul.f32 0.5, %v303_v2 }
 0x15e   :  { %v308_v5 = vmax.f32 %v306_v3, 0.0 }
 0x15f   :  { %v307_v6 = vmax.f32 %v305_v4, 0.0 }
 0x160   :  { %v310_v7 = vmin.f32 %v308_v5, 1.0 }
 0x161   :  { %v309_v8 = vmin.f32 %v307_v6, 1.0 }
 0x162   :  { %312 = vst [vmem:[#allocation7 + $0x8] sm:$0xff] %v310_v7 }
 0x163   :  { %311 = vst [vmem:[#allocation7] sm:$0xff] %v309_v8 }
 0x164   :  { %395 = shalt.err (!%p392_p6)
}
 0x165   :  { %s396_s12 = scalar_lea.hbm %s664_s2, 256 }
 0x166   :  { %p397_p7 = scmp.ne.s32.totalorder %s664_s2, %s396_s12  ;;  %p400_p8 = scmp.lt.u32.totalorder %s396_s12, %s664_s2 }
 0x168   :  { %p402_p9 = pnand %p400_p8, %p397_p7 }
 0x16a   :  { %405 = shalt.err (!%p402_p9)
}
 0x16b   :  { %322 = dma.vmem_to_hbm [thread:$0]  %s320_s8, 256, %s664_s2, [#allocation4]  }
 0x16c   :  { %410 = dma.done.wait [#allocation4], 256  }
 0x16d   :  { %411 = vsyncadd [#allocation4], 4294967040 }
 0x16e   :  { %326 = vsyncpa [#allocation3], 1 }
 0x16f   :  { %327 = vsyncpa [#allocation6], 1 }
 0x170   :  { %328 = vsyncpa [#allocation4], 1 }

</bundles_post_ra>
